<compile_context>
chip_gen: v7x
topology: tpu7x:2x2x1
jax: 0.10.0
libtpu: 0.0.40
codegen_flags: <defaults>
</compile_context>

<pallas_src>
import jax
import jax.numpy as jnp
import numpy as np
from jax.experimental import pallas as pl
from jax.experimental.pallas import tpu as pltpu


# Copies larger than this are split into up to 4 overlapped DMA streams.
_CHUNK_BYTES = 1 << 20  # 1 MiB


# ---------------------------------------------------------------------------
# Pallas kernel: HBM -> HBM identity copy (used only when a fresh buffer is needed)
# ---------------------------------------------------------------------------
def _make_dma_copy_kernel(chunks):
    """Build a copy kernel.

    `chunks` is either None (single full-ref DMA) or a tuple of static
    (start, size) pairs along the leading axis, one DMA + semaphore per chunk.
    """

    def kernel(x_ref, o_ref, sem):
        if chunks is None:
            cp = pltpu.make_async_copy(x_ref, o_ref, sem.at[0])
            cp.start()
            cp.wait()
            return
        copies = []
        for c, (start, size) in enumerate(chunks):
            cp = pltpu.make_async_copy(
                x_ref.at[pl.ds(start, size)],
                o_ref.at[pl.ds(start, size)],
                sem.at[c],
            )
            cp.start()  # launch all chunk DMAs back-to-back ...
            copies.append(cp)
        for cp in copies:  # ... then wait for all of them (overlapped streaming)
            cp.wait()

    return kernel


def pallas_identity_copy(img):
    """Materialize `img` into a distinct HBM buffer with a direct HBM->HBM DMA.

    No VMEM staging, no grid, no (8,128) constraints: works for any shape/dtype/size
    on v5e / v6e / v7x. Large arrays are copied as up to 4 overlapped DMA chunks.
    """
    shape = tuple(img.shape)
    nbytes = jnp.dtype(img.dtype).itemsize
    for d in shape:
        nbytes *= d

    if len(shape) == 0 or shape[0] < 2 or nbytes <= _CHUNK_BYTES:
        chunks = None
        num_sems = 1
    else:
        num_chunks = min(4, shape[0])
        base, rem = divmod(shape[0], num_chunks)
        chunks = []
        start = 0
        for c in range(num_chunks):
            size = base + (1 if c < rem else 0)
            chunks.append((start, size))
            start += size
        chunks = tuple(chunks)
        num_sems = num_chunks

    return pl.pallas_call(
        _make_dma_copy_kernel(chunks),
        out_shape=jax.ShapeDtypeStruct(shape, img.dtype),
        in_specs=[pl.BlockSpec(memory_space=pl.ANY)],
        out_specs=pl.BlockSpec(memory_space=pl.ANY),
        scratch_shapes=[pltpu.SemaphoreType.DMA((num_sems,))],
    )(img)


# ---------------------------------------------------------------------------
# Forward pass (matches ExampleModel.forward: return img)
# ---------------------------------------------------------------------------
def example_model_forward(img, img_metas=None, test_mode=False,
                          materialize_copy=False, **kwargs):
    """Pallas/JAX equivalent of ExampleModel.forward.

    The forward is an identity, so the optimal implementation moves zero bytes:
    it returns `img` unchanged (no HBM traffic, no kernel launch). If the caller
    needs the result in a *fresh* HBM buffer, pass `materialize_copy=True` to run
    the chunked HBM->HBM DMA Pallas kernel instead.
    """
    if materialize_copy:
        return pallas_identity_copy(img)
    return img


# ---------------------------------------------------------------------------
# Module parameters (constructed in __init__ but unused in forward, as in PyTorch)
# ---------------------------------------------------------------------------
def make_example_model_params(key):
    """Deterministic init of Conv2d(3, 3, kernel_size=3) weights + head config."""
    k_w, k_b = jax.random.split(key)
    fan_in = 3 * 3 * 3
    bound = 1.0 / (fan_in ** 0.5)
    conv_weight = jax.random.uniform(
        k_w, (3, 3, 3, 3), jnp.float32, minval=-bound, maxval=bound
    )  # (out_c, in_c, kh, kw) — PyTorch layout
    conv_bias = jax.random.uniform(k_b, (3,), jnp.float32, minval=-bound, maxval=bound)
    return {
        "conv_weight": conv_weight,
        "conv_bias": conv_bias,
        "head_num_classes": 4,
    }


def train_step(data_batch, optimizer=None):
    """Mirrors ExampleModel.train_step: loss = forward(**data_batch)."""
    loss = example_model_forward(**data_batch)
    return dict(loss=loss)


if __name__ == "__main__":
    key = jax.random.PRNGKey(0)
    k_params, k_img, k_big = jax.random.split(key, 3)

    # Parameters (unused in forward, exactly like the PyTorch module).
    params = make_example_model_params(k_params)

    # Module-consistent NCHW input for Conv2d(3, 3, 3): batch=2, C=3, H=W=16.
    img = jax.random.normal(k_img, (2, 3, 16, 16), dtype=jnp.float32)
    img_metas = [{} for _ in range(img.shape[0])]
    img_host = np.asarray(img)

    # Default forward: pure pass-through, zero bytes moved.
    out = jax.block_until_ready(example_model_forward(img, img_metas))
    assert out.shape == img.shape and out.dtype == img.dtype
    np.testing.assert_array_equal(np.asarray(out), img_host)

    # Pallas kernel path: distinct output buffer via single HBM->HBM DMA.
    out_copy = jax.block_until_ready(example_model_forward(img, img_metas,
                                                           materialize_copy=True))
    assert out_copy.shape == img.shape and out_copy.dtype == img.dtype
    np.testing.assert_array_equal(np.asarray(out_copy), img_host)

    # Exercise the chunked-DMA branch once: (32,128,128) f32 = 2 MiB -> 4 DMA chunks.
    big = jax.random.normal(k_big, (32, 128, 128), dtype=jnp.float32)
    big_host = np.asarray(big)
    big_out = jax.block_until_ready(pallas_identity_copy(big))
    np.testing.assert_array_equal(np.asarray(big_out), big_host)

    # train_step path (loss = forward(**data_batch), same identity semantics).
    result = train_step({"img": img, "img_metas": img_metas})
    jax.block_until_ready(result["loss"])

    print("KERNEL_OK")
</pallas_src>

<mosaic_0001>
module attributes {stable_mosaic.version = 11 : i64} {
  func.func @kernel(%arg0: memref<2x3x16x16xf32, #tpu.memory_space<any>>, %arg1: memref<2x3x16x16xf32, #tpu.memory_space<any>>, %arg2: memref<1x!tpu.dma_semaphore, #tpu.memory_space<semaphore_mem>>) attributes {dimension_semantics = [], scalar_prefetch = 0 : i64, scratch_operands = 1 : i64, tpu.core_type = #tpu.core_type<tc>} {
    %c0_i32 = arith.constant 0 : i32
    %0 = tpu.memref_slice %arg2[%c0_i32] : memref<1x!tpu.dma_semaphore, #tpu.memory_space<semaphore_mem>> -> memref<1x!tpu.dma_semaphore, #tpu.memory_space<semaphore_mem>>
    %1 = tpu.memref_squeeze %0 : memref<1x!tpu.dma_semaphore, #tpu.memory_space<semaphore_mem>> -> memref<!tpu.dma_semaphore, #tpu.memory_space<semaphore_mem>>
    tpu.enqueue_dma source(%arg0 : memref<2x3x16x16xf32, #tpu.memory_space<any>>) target(%arg1 : memref<2x3x16x16xf32, #tpu.memory_space<any>>) target_semaphore(%1 : memref<!tpu.dma_semaphore, #tpu.memory_space<semaphore_mem>>)
    %c0_i32_0 = arith.constant 0 : i32
    %2 = tpu.memref_slice %arg2[%c0_i32_0] : memref<1x!tpu.dma_semaphore, #tpu.memory_space<semaphore_mem>> -> memref<1x!tpu.dma_semaphore, #tpu.memory_space<semaphore_mem>>
    %3 = tpu.memref_squeeze %2 : memref<1x!tpu.dma_semaphore, #tpu.memory_space<semaphore_mem>> -> memref<!tpu.dma_semaphore, #tpu.memory_space<semaphore_mem>>
    tpu.wait_dma2 semaphore(%3 : memref<!tpu.dma_semaphore, #tpu.memory_space<semaphore_mem>>) src(%arg0 : memref<2x3x16x16xf32, #tpu.memory_space<any>>) dst(%arg1 : memref<2x3x16x16xf32, #tpu.memory_space<any>>)
    return
  }
}

</mosaic_0001>

<bundles_post_ra>
// kernel: tpu_custom_call.1
= control target key start
LH: loop header
LB: loop body
LE: loop exit
PB: predicated region body
PF: predicated region fallthrough
CT: control target
= control target key end

     0   :  { %s36_s6 = smov [#allocation2]   ;;  %s37_s7 = smov [#allocation3]   ;;  %s55_s0 = inlined_call_operand.hbm [shape: f32[2,3,16,16], index: 0, kind: input, shape index: {}]   ;;  %s56_s1 = inlined_call_operand.hbm [shape: f32[2,3,16,16], index: 1, kind: output, shape index: {}]  }
   0x1   :  { %s38_s8 = smov 0  }
   0x2   :  { %18 = dma.general %s55_s0, 1536, %s56_s1, %s36_s6, %s37_s7, [#allocation4], %s38_s8, 0  }
   0x3   :  { %34 = dma.done.wait [#allocation2], 1536 }
   0x4   :  { %35 = vsyncadd [#allocation2], 4294965760 }
   0x5   :  { %24 = vsyncmov [#allocation2] }
   0x8   :  { %s25_s13 = vpop.sfrf %24 }
   0x9   :  { %p30_p0 = scmp.ne.s32.totalorder %s25_s13, 0 }
   0xb   :  { %29 = shalt.err (%p30_p0)  }

</bundles_post_ra>
